<compile_context>
chip_gen: v7x
topology: tpu7x:2x2x1
jax: 0.10.0
libtpu: 0.0.40
codegen_flags: <defaults>
</compile_context>

<pallas_src>
import functools

import numpy as np
import jax
import jax.numpy as jnp
from jax.experimental import pallas as pl
from jax.experimental.pallas import tpu as pltpu


# ----------------------------------------------------------------------------
# Deterministic "configer" stand-in
# ----------------------------------------------------------------------------
CONFIG = dict(
    temperature=0.07,
    base_temperature=0.07,
    max_samples=1024,
    max_views=8,
    memory_size=100,
    contrast_loss_weight=0.1,
    # TODO(synk): FSAuxCELoss source not provided; standard openseg semantics
    # (weighted CE on main + aux predictions, ignore_index=-1) with fixed weights.
    seg_ce_weight=1.0,
    aux_ce_weight=0.4,
)


# ----------------------------------------------------------------------------
# Interpolation weight matrices (host-side, static shapes)
# ----------------------------------------------------------------------------
def _interp_weight_matrix(n_in, n_out):
    """(n_out, n_in) align_corners=True linear interpolation weights."""
    W = np.zeros((n_out, n_in), np.float32)
    if n_in == 1 or n_out == 1:
        W[:, 0] = 1.0
        return W
    pos = np.arange(n_out, dtype=np.float64) * (n_in - 1) / (n_out - 1)
    lo = np.clip(np.floor(pos).astype(np.int64), 0, n_in - 1)
    hi = np.minimum(lo + 1, n_in - 1)
    frac = (pos - lo).astype(np.float32)
    rows = np.arange(n_out)
    np.add.at(W, (rows, lo), 1.0 - frac)
    np.add.at(W, (rows, hi), frac)
    return W


# ----------------------------------------------------------------------------
# Pallas kernel 1: fused bilinear(align_corners) upsample + cross-entropy (ignore_index=-1)
#
#   grid = (N_heads*B, n_row_tiles), both axes "parallel" (per-(b,t) partial outputs).
#   Per step: low-res logits block (1, C, Hs, Ws) [resident per batch entry], Wr row tile
#   (TR, Hs), resident Wc^T (Ws, W), labels block (1, TR, W).  The upsampled logits for the
#   TR x W output pixels are built per class with two rank-2 MXU matmuls and consumed
#   immediately (streaming log-sum-exp over classes) — never touch HBM at full resolution.
# ----------------------------------------------------------------------------
def _fused_upsample_ce_kernel(seg_ref, wr_ref, wct_ref, lbl_ref, sum_ref, cnt_ref,
                              *, num_classes):
    wr = wr_ref[...]                     # (TR, Hs) f32 (zero rows beyond H)
    wct = wct_ref[...]                   # (Ws, W)  f32
    lbl = lbl_ref[0]                     # (TR, W)  int32 (-1 pad / ignore)

    # Per-class upsampled logit planes: (TR, Hs) @ (Hs, Ws) @ (Ws, W) -> (TR, W)
    logit_planes = []
    for c in range(num_classes):
        seg_c = seg_ref[0, c]            # (Hs, Ws) f32, static slab read
        tmp = jnp.dot(wr, seg_c, preferred_element_type=jnp.float32)       # (TR, Ws)
        logit_planes.append(jnp.dot(tmp, wct, preferred_element_type=jnp.float32))

    # Softmax cross-entropy over classes, streaming over the per-class planes.
    m = logit_planes[0]
    for c in range(1, num_classes):
        m = jnp.maximum(m, logit_planes[c])
    s = jnp.zeros_like(m)
    picked = jnp.zeros_like(m)
    for c in range(num_classes):
        s = s + jnp.exp(logit_planes[c] - m)
        picked = picked + jnp.where(lbl == c, logit_planes[c], 0.0)
    lse = jnp.log(s) + m                                                   # (TR, W)

    valid = lbl >= 0                                                       # (TR, W)
    nll = jnp.where(valid, lse - picked, 0.0)

    row_sum = jnp.sum(nll, axis=1, keepdims=True)                          # (TR, 1)
    row_cnt = jnp.sum(valid.astype(jnp.float32), axis=1, keepdims=True)    # (TR, 1)
    sum_ref[...] = jnp.sum(row_sum, axis=0, keepdims=True).reshape(1, 1, 1, 1)
    cnt_ref[...] = jnp.sum(row_cnt, axis=0, keepdims=True).reshape(1, 1, 1, 1)


def fused_upsample_ce_sums(logits_small, target, out_hw):
    """logits_small: (N, C, Hs, Ws) f32 (N may stack several heads over the batch axis),
    target: (B, H, W) int (ignore_index=-1), out_hw == (H, W).
    Returns per-entry (sum_of_nll, valid_pixel_count), each shape (N,)."""
    N, C, Hs, Ws = logits_small.shape
    B, H, W = target.shape
    oh, ow = out_hw
    assert (oh, ow) == (H, W)
    assert N % B == 0

    Wr = _interp_weight_matrix(Hs, H)           # (H, Hs)
    WcT = _interp_weight_matrix(Ws, W).T        # (Ws, W)  pre-transposed -> native (K,N) operand

    # Output-row tile: multiple of 8 rows, sized so the C live (TR, W) f32 planes stay ~<= 2 MiB.
    budget = 2 << 20
    tr = max(1, budget // max(C * W * 4, 1))
    tr = max(8, (tr // 8) * 8)
    tr = min(tr, 512)
    tr = min(tr, ((H + 7) // 8) * 8)
    h_pad = ((H + tr - 1) // tr) * tr
    nt = h_pad // tr

    wr_p = np.zeros((h_pad, Hs), np.float32)
    wr_p[:H] = Wr                                                     # zero rows beyond H
    lbl_p = jnp.pad(target.astype(jnp.int32), ((0, 0), (0, h_pad - H), (0, 0)),
                    constant_values=-1)                               # (B, h_pad, W)

    kern = functools.partial(_fused_upsample_ce_kernel, num_classes=C)
    sums, cnts = pl.pallas_call(
        kern,
        out_shape=(jax.ShapeDtypeStruct((N, nt, 1, 1), jnp.float32),
                   jax.ShapeDtypeStruct((N, nt, 1, 1), jnp.float32)),
        grid=(N, nt),
        in_specs=[pl.BlockSpec((1, C, Hs, Ws), lambda b, t: (b, 0, 0, 0)),   # low-res logits
                  pl.BlockSpec((tr, Hs), lambda b, t: (t, 0)),               # Wr row tile
                  pl.BlockSpec((Ws, W), lambda b, t: (0, 0)),                # Wc^T (resident)
                  pl.BlockSpec((1, tr, W), lambda b, t: (b % B, t, 0))],     # labels (shared)
        out_specs=(pl.BlockSpec((1, 1, 1, 1), lambda b, t: (b, t, 0, 0)),
                   pl.BlockSpec((1, 1, 1, 1), lambda b, t: (b, t, 0, 0))),
        compiler_params=pltpu.CompilerParams(
            dimension_semantics=("parallel", "parallel")),
    )(logits_small, jnp.asarray(wr_p), jnp.asarray(WcT), lbl_p)
    return sums.reshape(N, nt).sum(axis=1), cnts.reshape(N, nt).sum(axis=1)


# ----------------------------------------------------------------------------
# Pallas kernel 2: supervised contrastive core (PixelContrastLoss._contrastive, queue=None)
#   Row-tiled: each grid step handles TR anchor rows vs all Lp contrast columns.
#   Contrast operand is a resident, pre-transposed (D, Lp) bf16 block; masks are built
#   in-kernel from labels (padded to -1) plus small (TR,1)/(1,Lp) iotas.
# ----------------------------------------------------------------------------
def _contrastive_kernel(y_row_ref, y_col_ref, frow_ref, fcolT_ref,
                        loss_ref, cnt_ref, *, temperature, base_temperature, TR):
    r = pl.program_id(0)
    Lp = fcolT_ref.shape[1]

    # Fold 1/T into the (TR, D) anchor rows (TR*D mults instead of TR*Lp on the output).
    inv_t = 1.0 / temperature
    frow = (frow_ref[...].astype(jnp.float32) * inv_t).astype(jnp.bfloat16)   # (TR, D)
    logits = jax.lax.dot_general(
        frow, fcolT_ref[...], dimension_numbers=(((1,), (0,)), ((), ())),
        preferred_element_type=jnp.float32)                                   # (TR, Lp)

    y_row = y_row_ref[...]                                   # (TR, 1) f32, pad rows = -1
    y_col = y_col_ref[...]                                   # (1, Lp) f32, pad cols = -1
    col_valid = y_col >= 0.0                                 # (1, Lp)
    row_valid = (y_row >= 0.0).astype(jnp.float32)           # (TR, 1)

    row_ids = r * TR + jax.lax.broadcasted_iota(jnp.int32, (TR, 1), 0)
    col_ids = jax.lax.broadcasted_iota(jnp.int32, (1, Lp), 1)
    same = y_row == y_col                                    # (TR, Lp)
    pos = jnp.logical_and(jnp.logical_and(same, row_ids != col_ids), col_valid)
    neg = jnp.logical_and(jnp.logical_not(same), col_valid)

    # row max for numerical stability only (detached in the reference)
    stab = jnp.max(jnp.where(col_valid, logits, -jnp.inf), axis=1, keepdims=True)
    z = logits - stab
    ez = jnp.exp(z)
    neg_sum = jnp.sum(jnp.where(neg, ez, 0.0), axis=1, keepdims=True)         # (TR, 1)
    log_prob = z - jnp.log(ez + neg_sum)                                      # (TR, Lp)

    pos_cnt = jnp.sum(pos.astype(jnp.float32), axis=1, keepdims=True)         # (TR, 1)
    sum_lp = jnp.sum(jnp.where(pos, log_prob, 0.0), axis=1, keepdims=True)
    denom = jnp.where(pos_cnt > 0, pos_cnt, 1.0)      # reference divides by mask.sum(1);
    mean_lpp = sum_lp / denom                         # guard only protects padded rows
    loss_rows = (-(temperature / base_temperature)) * mean_lpp * row_valid

    loss_ref[...] = jnp.sum(loss_rows, axis=0, keepdims=True).reshape(1, 1, 1)
    cnt_ref[...] = jnp.sum(row_valid, axis=0, keepdims=True).reshape(1, 1, 1)


def contrastive_loss(feats_, labels_, *, temperature, base_temperature):
    """feats_: (A, n_view, D) f32, labels_: (A,) f32.  Mirrors _contrastive (queue=None)."""
    A, n_view, D = feats_.shape
    L = A * n_view
    # anchor_feature = cat(unbind(X, dim=1), dim=0)  ->  view-major ordering
    feat_full = jnp.transpose(feats_, (1, 0, 2)).reshape(L, D)
    y_full = jnp.tile(labels_.astype(jnp.float32), n_view)               # (L,)

    Lp = ((L + 127) // 128) * 128                                        # lane-dense columns
    if Lp <= 256:
        TR = 128                      # keep >= 2 parallel steps when possible (v7x 2 TCs)
    elif Lp % 256 == 0:
        TR = 256
    else:
        TR = 128
    nb = Lp // TR
    pad = Lp - L
    feat_p = jnp.pad(feat_full, ((0, pad), (0, 0)))
    y_p = jnp.pad(y_full, ((0, pad),), constant_values=-1.0)
    y_row = y_p.reshape(Lp, 1)
    y_col = y_p.reshape(1, Lp)
    feat_rows = feat_p.astype(jnp.bfloat16)                 # (Lp, D)  bf16 anchor rows (tiled)
    feat_colsT = feat_p.T.astype(jnp.bfloat16)              # (D, Lp)  bf16 contrast (resident)

    kern = functools.partial(_contrastive_kernel, temperature=float(temperature),
                             base_temperature=float(base_temperature), TR=TR)
    loss_parts, cnt_parts = pl.pallas_call(
        kern,
        out_shape=(jax.ShapeDtypeStruct((nb, 1, 1), jnp.float32),
                   jax.ShapeDtypeStruct((nb, 1, 1), jnp.float32)),
        grid=(nb,),
        in_specs=[pl.BlockSpec((TR, 1), lambda r: (r, 0)),    # row labels
                  pl.BlockSpec((1, Lp), lambda r: (0, 0)),    # column labels (resident)
                  pl.BlockSpec((TR, D), lambda r: (r, 0)),    # anchor rows (pipelined)
                  pl.BlockSpec((D, Lp), lambda r: (0, 0))],   # contrast feats^T (resident)
        out_specs=(pl.BlockSpec((1, 1, 1), lambda r: (r, 0, 0)),
                   pl.BlockSpec((1, 1, 1), lambda r: (r, 0, 0))),
        compiler_params=pltpu.CompilerParams(dimension_semantics=("parallel",)),
    )(y_row, y_col, feat_rows, feat_colsT)
    return jnp.sum(loss_parts) / jnp.sum(cnt_parts)


# ----------------------------------------------------------------------------
# JAX glue: nearest label resize
# ----------------------------------------------------------------------------
def nearest_resize_labels(lbl, out_hw):
    """lbl: (B, H, W); PyTorch F.interpolate(mode='nearest')."""
    B, H, W = lbl.shape
    oh, ow = out_hw
    ys = jnp.floor(jnp.arange(oh) * (H / oh)).astype(jnp.int32)
    xs = jnp.floor(jnp.arange(ow) * (W / ow)).astype(jnp.int32)
    return lbl[:, ys, :][:, :, xs]


# ----------------------------------------------------------------------------
# Host-side hard anchor sampling (PixelContrastLoss._hard_anchor_sampling)
# TODO(synk): data-dependent dynamic shapes (torch.unique / nonzero / randperm)
# have no clean static-shape Pallas equivalent; runs host-side in NumPy.
# ----------------------------------------------------------------------------
def hard_anchor_sampling_np(X, y_hat, y, max_samples, max_views, rng):
    batch_size, _, feat_dim = X.shape
    classes, total_classes = [], 0
    for ii in range(batch_size):
        this_y = y_hat[ii]
        cls = [c for c in np.unique(this_y) if c != -1]
        cls = [c for c in cls if int((this_y == c).sum()) > max_views]
        classes.append(cls)
        total_classes += len(cls)
    if total_classes == 0:
        return None, None

    n_view = min(max_samples // total_classes, max_views)
    X_ = np.zeros((total_classes, n_view, feat_dim), np.float32)
    y_ = np.zeros((total_classes,), np.float32)
    ptr = 0
    for ii in range(batch_size):
        this_y_hat, this_y = y_hat[ii], y[ii]
        for cls_id in classes[ii]:
            hard = np.nonzero((this_y_hat == cls_id) & (this_y != cls_id))[0]
            easy = np.nonzero((this_y_hat == cls_id) & (this_y == cls_id))[0]
            nh, ne = len(hard), len(easy)
            if nh >= n_view / 2 and ne >= n_view / 2:
                nh_keep = n_view // 2
                ne_keep = n_view - nh_keep
            elif nh >= n_view / 2:
                ne_keep = ne
                nh_keep = n_view - ne_keep
            elif ne >= n_view / 2:
                nh_keep = nh
                ne_keep = n_view - nh_keep
            else:
                raise Exception("insufficient samples per class")
            hard = hard[rng.permutation(nh)[:nh_keep]]
            easy = easy[rng.permutation(ne)[:ne_keep]]
            idx = np.concatenate([hard, easy], axis=0)
            X_[ptr] = X[ii, idx, :]
            y_[ptr] = cls_id
            ptr += 1
    return X_, y_


# ----------------------------------------------------------------------------
# Module wrappers
# ----------------------------------------------------------------------------
class PixelContrastLoss:
    def __init__(self, cfg):
        self.temperature = cfg["temperature"]
        self.base_temperature = cfg["base_temperature"]
        self.ignore_label = -1
        self.max_samples = cfg["max_samples"]
        self.max_views = min(cfg["max_views"], cfg["memory_size"])
        self.rng = np.random.default_rng(0)   # seeded once (stand-in for torch.randperm)

    def __call__(self, feats, labels, predict):
        B, D, He, We = feats.shape
        labels_e = nearest_resize_labels(labels.astype(jnp.float32), (He, We)).astype(jnp.int32)
        labels_e = labels_e.reshape(B, -1)
        predict = predict.reshape(B, -1)
        feats_flat = jnp.transpose(feats, (0, 2, 3, 1)).reshape(B, -1, D)

        # TODO(synk): sampling stays host-side (device->host sync each call).
        feats_, labels_ = hard_anchor_sampling_np(
            np.asarray(feats_flat), np.asarray(labels_e), np.asarray(predict),
            self.max_samples, self.max_views, self.rng)
        assert feats_ is not None, "no valid anchor classes found"
        return contrastive_loss(jnp.asarray(feats_), jnp.asarray(labels_),
                                temperature=self.temperature,
                                base_temperature=self.base_temperature)


class FSAuxCELoss:
    """Weighted CE on main + aux heads, ignore_index=-1.  Receives LOW-RES logits and fuses
    the bilinear(align_corners) upsample into the CE kernel (no full-res logits in HBM)."""

    def __init__(self, cfg):
        self.seg_w = cfg["seg_ce_weight"]
        self.aux_w = cfg["aux_ce_weight"]

    def __call__(self, inputs, target):
        pred_aux, pred = inputs            # [aux, main] ordering as in the reference
        B, H, W = target.shape
        if pred.shape == pred_aux.shape:
            # Stack main + aux so both heads run in one pallas_call (one launch, 2x parallel work).
            stacked = jnp.concatenate([pred, pred_aux], axis=0)
            sums, cnts = fused_upsample_ce_sums(stacked, target, (H, W))
            main = jnp.sum(sums[:B]) / jnp.maximum(jnp.sum(cnts[:B]), 1.0)
            aux = jnp.sum(sums[B:]) / jnp.maximum(jnp.sum(cnts[B:]), 1.0)
        else:
            s1, c1 = fused_upsample_ce_sums(pred, target, (H, W))
            s2, c2 = fused_upsample_ce_sums(pred_aux, target, (H, W))
            main = jnp.sum(s1) / jnp.maximum(jnp.sum(c1), 1.0)
            aux = jnp.sum(s2) / jnp.maximum(jnp.sum(c2), 1.0)
        return self.seg_w * main + self.aux_w * aux


class ContrastAuxCELoss:
    def __init__(self, cfg=CONFIG):
        self.loss_weight = cfg["contrast_loss_weight"]
        self.seg_criterion = FSAuxCELoss(cfg)
        self.contrast_criterion = PixelContrastLoss(cfg)

    def __call__(self, preds, target):
        seg, seg_aux = preds["seg"], preds["seg_aux"]
        embedding = preds.get("embedding", None)
        # bilinear upsample of seg / seg_aux to target size is fused inside the CE kernel
        loss = self.seg_criterion([seg_aux, seg], target)
        if embedding is not None:
            predict = jnp.argmax(seg, axis=1).astype(jnp.int32)
            loss_contrast = self.contrast_criterion(embedding, target, predict)
            return loss + self.loss_weight * loss_contrast
        return loss


# ----------------------------------------------------------------------------
if __name__ == "__main__":
    key = jax.random.PRNGKey(0)
    k_seg, k_aux, k_emb, k_tgt = jax.random.split(key, 4)

    B, NUM_CLS, Hs, Ws = 2, 4, 8, 8       # seg / seg_aux / embedding spatial resolution
    Ht, Wt = 16, 16                        # target (label) resolution
    D_EMB = 32

    seg = jax.random.normal(k_seg, (B, NUM_CLS, Hs, Ws), jnp.float32)
    seg_aux = jax.random.normal(k_aux, (B, NUM_CLS, Hs, Ws), jnp.float32)
    embedding = jax.random.normal(k_emb, (B, D_EMB, Hs, Ws), jnp.float32)
    # The reference pipeline's projection head L2-normalizes embeddings; the contrastive
    # loss (PyTorch included) is only finite in that regime at temperature=0.07.
    embedding = embedding / jnp.linalg.norm(embedding, axis=1, keepdims=True)
    target = jax.random.randint(k_tgt, (B, Ht, Wt), 0, NUM_CLS, jnp.int32)

    preds = {"seg": seg, "seg_aux": seg_aux, "embedding": embedding}

    loss_fn = ContrastAuxCELoss(CONFIG)
    loss = loss_fn(preds, target)
    loss = jax.block_until_ready(loss)
    assert np.isfinite(float(loss)), f"non-finite loss: {loss}"
    print("KERNEL_OK")
</pallas_src>

<mosaic_0001>
module attributes {stable_mosaic.version = 11 : i64} {
  func.func @_fused_upsample_ce_kernel(%arg0: i32, %arg1: i32, %arg2: memref<1x4x8x8xf32, #tpu.memory_space<vmem>>, %arg3: memref<16x8xf32, #tpu.memory_space<vmem>>, %arg4: memref<8x16xf32, #tpu.memory_space<vmem>>, %arg5: memref<1x16x16xi32, #tpu.memory_space<vmem>>, %arg6: memref<1x1x1x1xf32, #tpu.memory_space<vmem>>, %arg7: memref<1x1x1x1xf32, #tpu.memory_space<vmem>>) attributes {dimension_semantics = [#tpu.dimension_semantics<parallel>, #tpu.dimension_semantics<parallel>], iteration_bounds = array<i64: 4, 1>, scalar_prefetch = 0 : i64, scratch_operands = 0 : i64, tpu.core_type = #tpu.core_type<tc>, window_params = [{transform_indices = @transform_0, window_bounds = array<i64: 1, 4, 8, 8>}, {transform_indices = @transform_1, window_bounds = array<i64: 16, 8>}, {pipeline_mode = #tpu.pipeline_mode<synchronous>, transform_indices = @transform_2, window_bounds = array<i64: 8, 16>}, {transform_indices = @transform_3, window_bounds = array<i64: 1, 16, 16>}, {transform_indices = @transform_4, window_bounds = array<i64: 1, 1, 1, 1>}, {transform_indices = @transform_5, window_bounds = array<i64: 1, 1, 1, 1>}]} {
    %c0 = arith.constant 0 : index
    %c0_0 = arith.constant 0 : index
    %0 = vector.load %arg3[%c0, %c0_0] : memref<16x8xf32, #tpu.memory_space<vmem>>, vector<16x8xf32>
    %c0_1 = arith.constant 0 : index
    %c0_2 = arith.constant 0 : index
    %1 = vector.load %arg4[%c0_1, %c0_2] : memref<8x16xf32, #tpu.memory_space<vmem>>, vector<8x16xf32>
    %c0_3 = arith.constant 0 : index
    %c0_4 = arith.constant 0 : index
    %c0_5 = arith.constant 0 : index
    %2 = vector.load %arg5[%c0_3, %c0_4, %c0_5] : memref<1x16x16xi32, #tpu.memory_space<vmem>>, vector<1x16x16xi32>
    %3 = vector.shape_cast %2 : vector<1x16x16xi32> to vector<16x16xi32>
    %c0_6 = arith.constant 0 : index
    %c0_7 = arith.constant 0 : index
    %c0_8 = arith.constant 0 : index
    %c0_9 = arith.constant 0 : index
    %4 = vector.load %arg2[%c0_6, %c0_7, %c0_8, %c0_9] : memref<1x4x8x8xf32, #tpu.memory_space<vmem>>, vector<1x1x8x8xf32>
    %5 = vector.shape_cast %4 : vector<1x1x8x8xf32> to vector<8x8xf32>
    %cst = arith.constant dense<0.000000e+00> : vector<16x8xf32>
    %6 = tpu.matmul %0, %5, %cst {dimension_numbers = #tpu.dot_dimension_numbers<[1], [0], [0], [1], [0, 0, 1, 1], [], []>} : vector<16x8xf32>, vector<8x8xf32>, vector<16x8xf32> -> vector<16x8xf32>
    %cst_10 = arith.constant dense<0.000000e+00> : vector<16x16xf32>
    %7 = tpu.matmul %6, %1, %cst_10 {dimension_numbers = #tpu.dot_dimension_numbers<[1], [0], [0], [1], [0, 0, 1, 1], [], []>} : vector<16x8xf32>, vector<8x16xf32>, vector<16x16xf32> -> vector<16x16xf32>
    %c0_11 = arith.constant 0 : index
    %c1 = arith.constant 1 : index
    %c0_12 = arith.constant 0 : index
    %c0_13 = arith.constant 0 : index
    %8 = vector.load %arg2[%c0_11, %c1, %c0_12, %c0_13] : memref<1x4x8x8xf32, #tpu.memory_space<vmem>>, vector<1x1x8x8xf32>
    %9 = vector.shape_cast %8 : vector<1x1x8x8xf32> to vector<8x8xf32>
    %cst_14 = arith.constant dense<0.000000e+00> : vector<16x8xf32>
    %10 = tpu.matmul %0, %9, %cst_14 {dimension_numbers = #tpu.dot_dimension_numbers<[1], [0], [0], [1], [0, 0, 1, 1], [], []>} : vector<16x8xf32>, vector<8x8xf32>, vector<16x8xf32> -> vector<16x8xf32>
    %cst_15 = arith.constant dense<0.000000e+00> : vector<16x16xf32>
    %11 = tpu.matmul %10, %1, %cst_15 {dimension_numbers = #tpu.dot_dimension_numbers<[1], [0], [0], [1], [0, 0, 1, 1], [], []>} : vector<16x8xf32>, vector<8x16xf32>, vector<16x16xf32> -> vector<16x16xf32>
    %c0_16 = arith.constant 0 : index
    %c2 = arith.constant 2 : index
    %c0_17 = arith.constant 0 : index
    %c0_18 = arith.constant 0 : index
    %12 = vector.load %arg2[%c0_16, %c2, %c0_17, %c0_18] : memref<1x4x8x8xf32, #tpu.memory_space<vmem>>, vector<1x1x8x8xf32>
    %13 = vector.shape_cast %12 : vector<1x1x8x8xf32> to vector<8x8xf32>
    %cst_19 = arith.constant dense<0.000000e+00> : vector<16x8xf32>
    %14 = tpu.matmul %0, %13, %cst_19 {dimension_numbers = #tpu.dot_dimension_numbers<[1], [0], [0], [1], [0, 0, 1, 1], [], []>} : vector<16x8xf32>, vector<8x8xf32>, vector<16x8xf32> -> vector<16x8xf32>
    %cst_20 = arith.constant dense<0.000000e+00> : vector<16x16xf32>
    %15 = tpu.matmul %14, %1, %cst_20 {dimension_numbers = #tpu.dot_dimension_numbers<[1], [0], [0], [1], [0, 0, 1, 1], [], []>} : vector<16x8xf32>, vector<8x16xf32>, vector<16x16xf32> -> vector<16x16xf32>
    %c0_21 = arith.constant 0 : index
    %c3 = arith.constant 3 : index
    %c0_22 = arith.constant 0 : index
    %c0_23 = arith.constant 0 : index
    %16 = vector.load %arg2[%c0_21, %c3, %c0_22, %c0_23] : memref<1x4x8x8xf32, #tpu.memory_space<vmem>>, vector<1x1x8x8xf32>
    %17 = vector.shape_cast %16 : vector<1x1x8x8xf32> to vector<8x8xf32>
    %cst_24 = arith.constant dense<0.000000e+00> : vector<16x8xf32>
    %18 = tpu.matmul %0, %17, %cst_24 {dimension_numbers = #tpu.dot_dimension_numbers<[1], [0], [0], [1], [0, 0, 1, 1], [], []>} : vector<16x8xf32>, vector<8x8xf32>, vector<16x8xf32> -> vector<16x8xf32>
    %cst_25 = arith.constant dense<0.000000e+00> : vector<16x16xf32>
    %19 = tpu.matmul %18, %1, %cst_25 {dimension_numbers = #tpu.dot_dimension_numbers<[1], [0], [0], [1], [0, 0, 1, 1], [], []>} : vector<16x8xf32>, vector<8x16xf32>, vector<16x16xf32> -> vector<16x16xf32>
    %20 = arith.maximumf %7, %11 : vector<16x16xf32>
    %21 = arith.maximumf %20, %15 : vector<16x16xf32>
    %22 = arith.maximumf %21, %19 : vector<16x16xf32>
    %cst_26 = arith.constant 0.000000e+00 : f32
    %23 = vector.broadcast %cst_26 : f32 to vector<16x16xf32>
    %cst_27 = arith.constant 0.000000e+00 : f32
    %24 = vector.broadcast %cst_27 : f32 to vector<16x16xf32>
    %25 = arith.subf %7, %22 : vector<16x16xf32>
    %26 = math.exp %25 : vector<16x16xf32>
    %27 = arith.addf %23, %26 : vector<16x16xf32>
    %c0_i32 = arith.constant 0 : i32
    %28 = vector.broadcast %c0_i32 : i32 to vector<16x16xi32>
    %29 = arith.cmpi eq, %3, %28 : vector<16x16xi32>
    %cst_28 = arith.constant 0.000000e+00 : f32
    %30 = vector.broadcast %cst_28 : f32 to vector<16x16xf32>
    %31 = arith.select %29, %7, %30 : vector<16x16xi1>, vector<16x16xf32>
    %32 = arith.addf %24, %31 : vector<16x16xf32>
    %33 = arith.subf %11, %22 : vector<16x16xf32>
    %34 = math.exp %33 : vector<16x16xf32>
    %35 = arith.addf %27, %34 : vector<16x16xf32>
    %c1_i32 = arith.constant 1 : i32
    %36 = vector.broadcast %c1_i32 : i32 to vector<16x16xi32>
    %37 = arith.cmpi eq, %3, %36 : vector<16x16xi32>
    %cst_29 = arith.constant 0.000000e+00 : f32
    %38 = vector.broadcast %cst_29 : f32 to vector<16x16xf32>
    %39 = arith.select %37, %11, %38 : vector<16x16xi1>, vector<16x16xf32>
    %40 = arith.addf %32, %39 : vector<16x16xf32>
    %41 = arith.subf %15, %22 : vector<16x16xf32>
    %42 = math.exp %41 : vector<16x16xf32>
    %43 = arith.addf %35, %42 : vector<16x16xf32>
    %c2_i32 = arith.constant 2 : i32
    %44 = vector.broadcast %c2_i32 : i32 to vector<16x16xi32>
    %45 = arith.cmpi eq, %3, %44 : vector<16x16xi32>
    %cst_30 = arith.constant 0.000000e+00 : f32
    %46 = vector.broadcast %cst_30 : f32 to vector<16x16xf32>
    %47 = arith.select %45, %15, %46 : vector<16x16xi1>, vector<16x16xf32>
    %48 = arith.addf %40, %47 : vector<16x16xf32>
    %49 = arith.subf %19, %22 : vector<16x16xf32>
    %50 = math.exp %49 : vector<16x16xf32>
    %51 = arith.addf %43, %50 : vector<16x16xf32>
    %c3_i32 = arith.constant 3 : i32
    %52 = vector.broadcast %c3_i32 : i32 to vector<16x16xi32>
    %53 = arith.cmpi eq, %3, %52 : vector<16x16xi32>
    %cst_31 = arith.constant 0.000000e+00 : f32
    %54 = vector.broadcast %cst_31 : f32 to vector<16x16xf32>
    %55 = arith.select %53, %19, %54 : vector<16x16xi1>, vector<16x16xf32>
    %56 = arith.addf %48, %55 : vector<16x16xf32>
    %57 = math.log %51 : vector<16x16xf32>
    %58 = arith.addf %57, %22 : vector<16x16xf32>
    %c0_i32_32 = arith.constant 0 : i32
    %59 = vector.broadcast %c0_i32_32 : i32 to vector<16x16xi32>
    %60 = arith.cmpi sge, %3, %59 : vector<16x16xi32>
    %61 = arith.subf %58, %56 : vector<16x16xf32>
    %cst_33 = arith.constant 0.000000e+00 : f32
    %62 = vector.broadcast %cst_33 : f32 to vector<16x16xf32>
    %63 = arith.select %60, %61, %62 : vector<16x16xi1>, vector<16x16xf32>
    %cst_34 = arith.constant dense<0.000000e+00> : vector<16xf32>
    %64 = vector.multi_reduction <add>, %63, %cst_34 [1] : vector<16x16xf32> to vector<16xf32>
    %65 = vector.shape_cast %64 : vector<16xf32> to vector<16x1xf32>
    %66 = arith.extui %60 : vector<16x16xi1> to vector<16x16xi32>
    %67 = arith.sitofp %66 : vector<16x16xi32> to vector<16x16xf32>
    %cst_35 = arith.constant dense<0.000000e+00> : vector<16xf32>
    %68 = vector.multi_reduction <add>, %67, %cst_35 [1] : vector<16x16xf32> to vector<16xf32>
    %69 = vector.shape_cast %68 : vector<16xf32> to vector<16x1xf32>
    %cst_36 = arith.constant dense<0.000000e+00> : vector<1xf32>
    %70 = vector.multi_reduction <add>, %65, %cst_36 [0] : vector<16x1xf32> to vector<1xf32>
    %71 = vector.shape_cast %70 : vector<1xf32> to vector<1x1xf32>
    %72 = vector.shape_cast %71 : vector<1x1xf32> to vector<1x1x1x1xf32>
    %c0_37 = arith.constant 0 : index
    %c0_38 = arith.constant 0 : index
    %c0_39 = arith.constant 0 : index
    %c0_40 = arith.constant 0 : index
    %73 = vector.load %arg6[%c0_37, %c0_38, %c0_39, %c0_40] : memref<1x1x1x1xf32, #tpu.memory_space<vmem>>, vector<1x1x1x1xf32>
    tpu.vector_store %arg6[%c0_37, %c0_38, %c0_39, %c0_40], %72 {strides = array<i32>} : memref<1x1x1x1xf32, #tpu.memory_space<vmem>>, vector<1x1x1x1xf32>,
    %cst_41 = arith.constant dense<0.000000e+00> : vector<1xf32>
    %74 = vector.multi_reduction <add>, %69, %cst_41 [0] : vector<16x1xf32> to vector<1xf32>
    %75 = vector.shape_cast %74 : vector<1xf32> to vector<1x1xf32>
    %76 = vector.shape_cast %75 : vector<1x1xf32> to vector<1x1x1x1xf32>
    %c0_42 = arith.constant 0 : index
    %c0_43 = arith.constant 0 : index
    %c0_44 = arith.constant 0 : index
    %c0_45 = arith.constant 0 : index
    %77 = vector.load %arg7[%c0_42, %c0_43, %c0_44, %c0_45] : memref<1x1x1x1xf32, #tpu.memory_space<vmem>>, vector<1x1x1x1xf32>
    tpu.vector_store %arg7[%c0_42, %c0_43, %c0_44, %c0_45], %76 {strides = array<i32>} : memref<1x1x1x1xf32, #tpu.memory_space<vmem>>, vector<1x1x1x1xf32>,
    return
  }
  func.func @transform_0(%arg0: i32, %arg1: i32) -> (i32, i32, i32, i32) {
    %c0_i32 = arith.constant 0 : i32
    %c0_i32_0 = arith.constant 0 : i32
    %c0_i32_1 = arith.constant 0 : i32
    %c0_i32_2 = arith.constant 0 : i32
    return %arg0, %c0_i32, %c0_i32_0, %c0_i32_1 : i32, i32, i32, i32
  }
  func.func @transform_1(%arg0: i32, %arg1: i32) -> (i32, i32) {
    %c0_i32 = arith.constant 0 : i32
    %c0_i32_0 = arith.constant 0 : i32
    return %arg1, %c0_i32 : i32, i32
  }
  func.func @transform_2(%arg0: i32, %arg1: i32) -> (i32, i32) {
    %c0_i32 = arith.constant 0 : i32
    %c0_i32_0 = arith.constant 0 : i32
    %c0_i32_1 = arith.constant 0 : i32
    return %c0_i32, %c0_i32_0 : i32, i32
  }
  func.func @transform_3(%arg0: i32, %arg1: i32) -> (i32, i32, i32) {
    %c2_i32 = arith.constant 2 : i32
    %c0_i32 = arith.constant 0 : i32
    %0 = arith.cmpi eq, %c2_i32, %c0_i32 : i32
    %c1_i32 = arith.constant 1 : i32
    %1 = arith.select %0, %c1_i32, %c2_i32 : i32
    %2 = arith.remsi %arg0, %1 : i32
    %c0_i32_0 = arith.constant 0 : i32
    %3 = arith.cmpi ne, %2, %c0_i32_0 : i32
    %c0_i32_1 = arith.constant 0 : i32
    %4 = arith.cmpi slt, %2, %c0_i32_1 : i32
    %c0_i32_2 = arith.constant 0 : i32
    %5 = arith.cmpi slt, %1, %c0_i32_2 : i32
    %6 = arith.xori %4, %5 : i1
    %7 = arith.andi %6, %3 : i1
    %8 = arith.addi %2, %1 : i32
    %9 = arith.select %7, %8, %2 : i32
    %c0_i32_3 = arith.constant 0 : i32
    %c0_i32_4 = arith.constant 0 : i32
    return %9, %arg1, %c0_i32_3 : i32, i32, i32
  }
  func.func @transform_4(%arg0: i32, %arg1: i32) -> (i32, i32, i32, i32) {
    %c0_i32 = arith.constant 0 : i32
    %c0_i32_0 = arith.constant 0 : i32
    %c0_i32_1 = arith.constant 0 : i32
    return %arg0, %arg1, %c0_i32, %c0_i32_0 : i32, i32, i32, i32
  }
  func.func @transform_5(%arg0: i32, %arg1: i32) -> (i32, i32, i32, i32) {
    %c0_i32 = arith.constant 0 : i32
    %c0_i32_0 = arith.constant 0 : i32
    %c0_i32_1 = arith.constant 0 : i32
    return %arg0, %arg1, %c0_i32, %c0_i32_0 : i32, i32, i32, i32
  }
}

</mosaic_0001>

<bundles_post_ra>
// kernel: tpu_custom_call.1
= control target key start
LH: loop header
LB: loop body
LE: loop exit
PB: predicated region body
PF: predicated region fallthrough
CT: control target
= control target key end

     0   :  { %11 = vsyncpa [#allocation3], 0  ;;  %s1921_s0 = inlined_call_operand.hbm [shape: f32[4,4,8,8], index: 0, kind: input, shape index: {}]   ;;  %s1922_s1 = inlined_call_operand.vmem [shape: f32[16,8], index: 1, kind: input, shape index: {}]   ;;  %s1923_s2 = inlined_call_operand.hbm [shape: f32[8,16], index: 2, kind: input, shape index: {}]   ;;  %s1924_s3 = inlined_call_operand.vmem [shape: s32[2,16,16], index: 3, kind: input, shape index: {}]   ;;  %s1925_s4 = inlined_call_operand.vmem [shape: f32[4,1,1,1], index: 4, kind: output, shape index: {0}]   ;;  %s1926_s5 = inlined_call_operand.vmem [shape: f32[4,1,1,1], index: 5, kind: output, shape index: {1}]  }
   0x1   :  { %13 = vsyncpa [#allocation3 + $0x1], 0 }
   0x2   :  { %14 = vsyncpa [#allocation5], 0  ;;  %s1689_s18 = smov 0   ;;  %s1691_s19 = smov 0  }
   0x3   :  { %s1693_s20 = smov 0   ;;  %s1695_s21 = smov 0  }
   0x4   :  { %s1697_s22 = smov 0   ;;  %s1699_s23 = smov 0  }
   0x5 LB: > { %s1339_s24 = sadd.s32 4294967295, %s1652_s23   ;;  %s39_s25 = sadd.s32 1, %s1640_s20  ;;  %s1652_s23 = sphi %s1699_s23, %s20_s23   ;;  %s1648_s22 = sphi %s1697_s22, %s1947_s22   ;;  %s1644_s21 = sphi %s1695_s21, %s1946_s21   ;;  %s1640_s20 = sphi %s1693_s20, %s1945_s20   ;;  %s1636_s19 = sphi %s1691_s19, %s1944_s19   ;;  %s1632_s18 = sphi %s1689_s18, %s1943_s18  }
   0x6   : > { %p46_p0 = scmp.ne.s32.totalorder %s1640_s20, %s1636_s19  ;;  %p47_p1 = scmp.eq.s32.totalorder %s1652_s23, 0 }
   0x7   : > { %p52_p2 = scmp.ne.s32.totalorder %s1636_s19, %s1632_s18  ;;  %p1723_p3 = scmp.eq.s32.totalorder %s1339_s24, 0 }
   0x8   : > { %p48_p4 = por %p47_p1, %p46_p0  ;;  %p1347_p5 = scmp.ge.s32.totalorder %s1652_s23, 1 }
   0x9   : > { %s1932_s26 = scalar_select %p1723_p3, 1, 0 }
   0xa   : > { %p1730_p6 = por %p1723_p3, %p52_p2  ;;  %p218_p7 = scmp.lt.s32.totalorder %s1652_s23, 5 }
   0xb   : > { %s1654_s29 = smov [#allocation4]   ;;  %p1466_p10 = scmp.lt.s32.totalorder %s1652_s23, 4 }
   0xc   : > { %s1933_s27 = scalar_select %p1730_p6, 1, 0 }
   0xd   : > { %p1735_p8 = pnand %p1347_p5, %p218_p7  ;;  %s240_s30 = sshll.u32 %s1654_s29, 4  ;;  %s241_s30 = int_to_ptr.vmem [resolvable:$true] %s240_s30 }
   0xe   : > { %s251_s6 = sand.u32 1, %s1640_s20   ;;  %p1749_p12 = pnand %p1466_p10, %p48_p4 }
   0xf   : > { %s1934_s28 = scalar_select %p1735_p8, 1, 0 }
  0x10   : > { %p1457_p9 = pneg %p1735_p8  ;;  %s1540_s11 = scalar_lea.hbm %s1923_s2, 128 }
  0x11   : > { %s1936_s8 = scalar_select %p1749_p12, 1, 0 }
  0x12   : > { %p1745_p11 = pnand %p1457_p9, %p1723_p3  ;;  %p1541_p13 = scmp.ne.s32.totalorder %s1923_s2, %s1540_s11 }
  0x13   : > { %p1547_p5 = scmp.lt.u32.totalorder %s1540_s11, %s1923_s2 }
  0x14   : > { %p1542_p0 = pneg %p1745_p11 }
  0x16   : > { %p1543_p1 = pnand %p1542_p0, %p1541_p13 }
  0x18   : > { %p1544_p2 = pneg %p1543_p1 }
  0x1a   : > { %p1549_p4 = pnand %p1547_p5, %p1544_p2 }
  0x1c   : > { %1552 = shalt.err (!%p1549_p4)
}
  0x1d   : > { %s1553_s16 = scalar_lea.vmem %s241_s30, 128  ;;  %p1561_p3 = scmp.lt.s32.totalorder %s241_s30, %s241_s30 }
  0x1e   : > { %p1554_p7 = scmp.ne.s32.totalorder %s241_s30, %s1553_s16  ;;  %p1562_p6 = scmp.lt.s32.totalorder %s1553_s16, %s1553_s16 }
  0x20   : > { %p1556_p9 = pnand %p1554_p7, %p1542_p0  ;;  %p1563_p8 = por %p1562_p6, %p1561_p3 }
  0x22   : > { %p1557_p10 = pneg %p1556_p9 }
  0x24   : > { %p1564_p12 = pnand %p1563_p8, %p1557_p10 }
  0x26   : > { %1567 = shalt.err (!%p1564_p12)
}
  0x27   : > { %1460 = dma.hbm_to_vmem [thread:$0]  (!%p1745_p11), %s1923_s2, 128, %s241_s30, [#allocation5]  }
  0x28   : > { %s32_s24 = sadd.s32 1, %s1648_s22  ;;  %s1351_s29 = sshll.u32 %s251_s6, 5 }
  0x29   : > { %p34_p13 = scmp.ge.s32.totalorder %s32_s24, 4  ;;  %s1385_s9 = sshll.u32 %s1648_s22, 9 }
  0x2a   : > { %s255_s10 = scalar_lea.vmem [#allocation2], %s1351_s29  ;;  %s1778_s13 = scalar_lea.hbm %s1921_s0, %s1385_s9 }
  0x2b   : > { %s262_s11 = sshll.u32 %s255_s10, 4  ;;  %s1949_s24 = smov (%p34_p13, %s32_s24), 0  ;;  %s1780_s11 = int_to_ptr.vmem [resolvable:$true] %s262_s11 }
  0x2c   : > { %s36_s30 = ssub.s32 %s1648_s22, %s1949_s24  ;;  %s1790_s15 = scalar_lea.sflag [#allocation3], %s251_s6 }
  0x2d   : > { %p1784_p3 = scmp.eq.s32.totalorder %s36_s30, 0  ;;  %s1568_s16 = scalar_lea.hbm %s1778_s13, 512 }
  0x2e   : > { %p1569_p6 = scmp.ne.s32.totalorder %s1778_s13, %s1568_s16  ;;  %p1938_p8 = scmp.ne.s32.totalorder %s1936_s8, 0 }
  0x2f   : > { %s1573_s29 = scalar_lea.hbm %s1921_s0, 2048  ;;  %p1574_p1 = scmp.lt.u32.totalorder %s1778_s13, %s1921_s0 }
  0x30   : > { %p1570_p11 = pneg %p1938_p8  ;;  %p1575_p2 = scmp.lt.u32.totalorder %s1573_s29, %s1568_s16 }
  0x31   : > { %p1577_p4 = scmp.lt.u32.totalorder %s1568_s16, %s1778_s13 }
  0x32   : > { %p1571_p12 = pnand %p1570_p11, %p1569_p6  ;;  %p1576_p5 = por %p1575_p2, %p1574_p1 }
  0x34   : > { %p1572_p0 = pneg %p1571_p12  ;;  %p1578_p7 = por %p1577_p4, %p1576_p5 }
  0x36   : > { %p1579_p9 = pnand %p1578_p7, %p1572_p0 }
  0x38   : > { %1582 = shalt.err (!%p1579_p9)
}
  0x39   : > { %s1583_s6 = scalar_lea.vmem %s1780_s11, 512  ;;  %s1655_s7 = smov [#allocation2]  }
  0x3a   : > { %p1584_p10 = scmp.ne.s32.totalorder %s1780_s11, %s1583_s6  ;;  %s1588_s12 = sshll.u32 %s1655_s7, 4  ;;  %s1589_s12 = int_to_ptr.vmem [resolvable:$false] %s1588_s12 }
  0x3b   : > { %s1590_s30 = scalar_lea.vmem %s1589_s12, 1024  ;;  %p1591_p12 = scmp.lt.s32.totalorder %s1780_s11, %s1589_s12 }
  0x3c   : > { %p1586_p13 = pnand %p1584_p10, %p1570_p11  ;;  %p1592_p1 = scmp.lt.s32.totalorder %s1590_s30, %s1583_s6 }
  0x3e   : > { %p1587_p6 = pneg %p1586_p13  ;;  %p1593_p2 = por %p1592_p1, %p1591_p12 }
  0x40   : > { %p1594_p5 = pnand %p1593_p2, %p1587_p6 }
  0x42   : > { %1597 = shalt.err (!%p1594_p5)
}
  0x43   : > { %s1656_s16 = smov 128   ;;  %s1657_s17 = smov 8  }
  0x44   : > { %1464 = dma.hbm_to_vmem [thread:$0]  (!%p1938_p8), %s1778_s13, 512, %s1780_s11, %s1790_s15, %s1656_s16, %s1656_s16, %s1657_s17  }
  0x45   : > { %s1823_s18 = scalar_select %p1784_p3, %s1640_s20, %s39_s25  }
  0x46   : > { %p1939_p11 = scmp.ne.s32.totalorder %s1934_s28, 0 }
  0x47   : > { %s313_s29 = sand.u32 (!%p1939_p11), 1, %s1636_s19   ;;  %p1940_p0 = scmp.ne.s32.totalorder (!%p1939_p11), %s1933_s27, 0 }
  0x48   : > { %311 = sbr.rel (%p1939_p11) target bundleno = 732 (0x2dc), region = 36  ;;  %s1355_s9 = sshll.u32 (!%p1939_p11), %s313_s29, 5 }
  0x49   : > { %s314_s10 = scalar_lea.sflag (!%p1939_p11), [#allocation3], %s313_s29  ;;  %s317_s6 = scalar_lea.vmem (!%p1939_p11), [#allocation2], %s1355_s9 }
  0x4f   : > { %1623 = dma.done.wait (%p1940_p0), %s314_s10, 512  }
  0x50   : > { %1625 = vsyncadd (%p1940_p0), %s314_s10, 4294966784  ;;  %p1941_p8 = scmp.ne.s32.totalorder %s1932_s26, 0 }
  0x52   : > { %1627 = dma.done.wait (%p1941_p8), [#allocation5], 128  }
  0x53   : > { %1629 = vsyncadd (%p1941_p8), [#allocation5], 4294967168  ;;  %vm439_vm0 = vcmask 64512   ;;  %v438_v0 = vld [vmem:[%s317_s6] sm:$0xff]  ;;  %v434_v2 = vld [vmem:[%s1922_s1 + $0x8] sm:$0xff]  ;;  %s388_s26 = ssub.s32 0, %s1644_s21 }
  0x54   : > { %v433_v1 = vld [vmem:[%s1922_s1] sm:$0xff]  ;;  %1411 = vmatprep.subr.mxu0 %v438_v0  ;;  %v1366_v3 = vld [vmem:[%s317_s6 + $0x8] sm:$0xff]  ;;  %v1371_v4 = vld [vmem:[%s317_s6 + $0x10] sm:$0xff]  ;;  %s1357_s27 = smin.u32 %s1644_s21, %s388_s26  ;;  %p387_p3 = scmp.lt.s32.totalorder %s1644_s21, 0  ;;  %vm1150_vm2 = vcmask 130048   ;;  %v1658_v17 = vmov 0.0  }
  0x55   : > { %1413 = vmatprep.mubr.msk.f32.mxu0 %vm439_vm0, %v433_v1  ;;  %1412 = vmatpush3.msra.mxu0 %v438_v0  ;;  %v1376_v5 = vld [vmem:[%s317_s6 + $0x18] sm:$0xff]  ;;  %v435_v6 = vld [vmem:[#allocation4] sm:$0xff]  ;;  %s390_s13 = sand.u32 1, %s1357_s27   ;;  %p421_p9 = scmp.lt.s32.totalorder %s1644_s21, 3  ;;  %vm1174_vm12 = vcmask 0  }
  0x56   : > { %1414 = vmatmul.mubr.msk.f32.vlgmr.msra.gmra.mrb[0].mxu0 %vm439_vm0, %v434_v2  ;;  %1421 = vmatprep.subr.mxu0 %v1366_v3  ;;  %s391_s14 = ssub.s32 0, %s390_s13 }
  0x57   : > { %1422 = vmatpush3.msra.mxu0 %v1366_v3  ;;  %1423 = vmatprep.mubr.msk.f32.mxu0 %vm439_vm0, %v433_v1  ;;  %s1951_s14 = smov (!%p387_p3, %s391_s14), %s390_s13  ;;  %s1957_s21 = smov (!%p421_p9, %s1644_s21), 3 }
  0x58   : > { %1431 = vmatprep.subr.mxu0 %v1371_v4  ;;  %1416 = vmatprep.subr.mxu1 %v435_v6  ;;  %p1359_p4 = scmp.lt.s32.totalorder %s1951_s14, 0  ;;  %s397_s15 = sadd.s32 2, %s1951_s14 }
  0x59   : > { %1417 = vmatpush3.msra.mxu1 %v435_v6  ;;  %s432_s9 = scalar_lea.vmem %s1926_s5, %s1957_s21  ;;  %s426_s25 = scalar_lea.vmem %s1925_s4, %s1957_s21 }
  0x5a   : > { %1424 = vmatmul.mubr.msk.f32.vlgmr.msra.gmra.mrb[2].mxu0 %vm439_vm0, %v434_v2  ;;  %1426 = vmatprep.subr.mxu1 %v435_v6  ;;  %s1953_s15 = smov (!%p1359_p4, %s397_s15), %s1951_s14 }
  0x5b   : > { %1432 = vmatpush3.msra.mxu0 %v1371_v4  ;;  %1433 = vmatprep.mubr.msk.f32.mxu0 %vm439_vm0, %v433_v1  ;;  %p400_p7 = scmp.lt.s32.totalorder %s1953_s15, 1 }
  0x5c   : > { %1441 = vmatprep.subr.mxu0 %v1376_v5 }
  0x5d   : > { %s1955_s15 = smov (!%p400_p7, %s1953_s15), 1 }
  0x5e   : > { %1434 = vmatmul.mubr.msk.f32.vlgmr.msra.gmra.mrb[4].mxu0 %vm439_vm0, %v434_v2  ;;  %s1386_s7 = sshll.u32 %s1955_s15, 4 }
  0x5f   : > { %1442 = vmatpush3.msra.mxu0 %v1376_v5  ;;  %1443 = vmatprep.mubr.msk.f32.mxu0 %vm439_vm0, %v433_v1  ;;  %s407_s16 = scalar_lea.vmem %s1924_s3, %s1386_s7 }
  0x60   : > { %v1864_v15 = vld [vmem:[%s407_s16 + $0x8] sm:$0xff]  ;;  %v1866_v16 = vld [vmem:[%s407_s16] sm:$0xff] }
  0x61   : > { %vm1144_vm1 = vcmp.ge.s32.totalorder %v1866_v16, 0  ;;  %vm1145_vm3 = vcmp.ge.s32.totalorder %v1864_v15, 0  ;;  %vm1091_vm4 = vcmp.eq.s32.totalorder %v1864_v15, 0  ;;  %vm1090_vm5 = vcmp.eq.s32.totalorder %v1866_v16, 0 }
  0x62   : > { %1444 = vmatmul.mubr.msk.f32.vlgmr.msra.gmra.mrb[6].mxu0 %vm439_vm0, %v434_v2  ;;  %v1381_v18 = vsel %vm1144_vm1, 1.0, %v1658_v17  ;;  %v1382_v19 = vsel %vm1145_vm3, 1.0, %v1658_v17  ;;  %vm1105_vm6 = vcmp.eq.s32.totalorder %v1864_v15, 1  ;;  %vm1104_vm7 = vcmp.eq.s32.totalorder %v1866_v16, 1 }
  0x63   : > { %v1161_v20 = vsel %vm1150_vm2, %v1381_v18, 0.0  ;;  %v1164_v21 = vsel %vm1150_vm2, %v1382_v19, 0.0  ;;  %vm1119_vm8 = vcmp.eq.s32.totalorder %v1864_v15, 2  ;;  %vm1118_vm9 = vcmp.eq.s32.totalorder %v1866_v16, 2 }
  0x64   : > { %1162 = vadd.xlane.f32.xlu1 %v1161_v20  ;;  %vm1133_vm10 = vcmp.eq.s32.totalorder %v1864_v15, 3  ;;  %vm1132_vm11 = vcmp.eq.s32.totalorder %v1866_v16, 3 }
  0x68   : > { %1165 = vadd.xlane.f32.xlu1 %v1164_v21 }
  0xf1   : > { %v1163_v18 = vpop.xlane.xlu1 %1162 }
  0xf5   : > { %v1166_v19 = vpop.xlane.xlu1 %1165 }
  0xf6   : > { %v1176_v21 = vadd.f32 %v1166_v19, %v1163_v18 }
 0x129   : > { %v1415_v7 = vpop.f32.mrb[0].mxu0 }
 0x12a   : > { %v512_v8 = vpop.f32.mrb[1].mxu0 }
 0x12b   : > { %1418 = vmatprep.mubr.msk.f32.mxu1 %vm439_vm0, %v512_v8 }
 0x12c   : > { %1419 = vmatmul.mubr.msk.f32.vlgmr.msra.gmra.mrb[0].mxu1 %vm439_vm0, %v1415_v7 }
 0x12d   : > { %v1425_v9 = vpop.f32.mrb[2].mxu0  ;;  %1427 = vmatpush3.msra.mxu1 %v435_v6 }
 0x12e   : > { %v670_v10 = vpop.f32.mrb[3].mxu0  ;;  %1436 = vmatprep.subr.mxu1 %v435_v6 }
 0x12f   : > { %1428 = vmatprep.mubr.msk.f32.mxu1 %vm439_vm0, %v670_v10 }
 0x130   : > { %1429 = vmatmul.mubr.msk.f32.vlgmr.msra.gmra.mrb[2].mxu1 %vm439_vm0, %v1425_v9 }
 0x131   : > { %v1435_v11 = vpop.f32.mrb[4].mxu0  ;;  %1437 = vmatpush3.msra.mxu1 %v435_v6 }
 0x132   : > { %v828_v12 = vpop.f32.mrb[5].mxu0  ;;  %1446 = vmatprep.subr.mxu1 %v435_v6 }
 0x133   : > { %1438 = vmatprep.mubr.msk.f32.mxu1 %vm439_vm0, %v828_v12 }
 0x134   : > { %1439 = vmatmul.mubr.msk.f32.vlgmr.msra.gmra.mrb[4].mxu1 %vm439_vm0, %v1435_v11 }
 0x135   : > { %v1445_v13 = vpop.f32.mrb[6].mxu0  ;;  %1447 = vmatpush3.msra.mxu1 %v435_v6 }
 0x136   : > { %v986_v14 = vpop.f32.mrb[7].mxu0 }
 0x137   : > { %1448 = vmatprep.mubr.msk.f32.mxu1 %vm439_vm0, %v986_v14 }
 0x138   : > { %1449 = vmatmul.mubr.msk.f32.vlgmr.msra.gmra.mrb[6].mxu1 %vm439_vm0, %v1445_v13 }
 0x1ff   : > { %v1420_v22 = vpop.f32.mrb[0].mxu1 }
 0x200   : > { %v1093_v23 = vsel %vm1091_vm4, %v1420_v22, 0.0  ;;  %v593_v24 = vpop.f32.mrb[1].mxu1 }
 0x201   : > { %v1092_v25 = vsel %vm1090_vm5, %v593_v24, 0.0 }
 0x203   : > { %v1430_v26 = vpop.f32.mrb[2].mxu1 }
 0x204   : > { %v1077_v27 = vmax.f32 %v1420_v22, %v1430_v26  ;;  %v1107_v28 = vsel %vm1105_vm6, %v1430_v26, 0.0  ;;  %v751_v29 = vpop.f32.mrb[3].mxu1 }
 0x205   : > { %v1109_v30 = vadd.f32 %v1107_v28, %v1093_v23  ;;  %v1076_v31 = vmax.f32 %v593_v24, %v751_v29  ;;  %v1106_v32 = vsel %vm1104_vm7, %v751_v29, 0.0  ;;  %v1177_v23 = vrot.slane %v1176_v21, 4 }
 0x206   : > { %v1108_v33 = vadd.f32 %v1106_v32, %v1092_v25 }
 0x207   : > { %v1440_v34 = vpop.f32.mrb[4].mxu1 }
 0x208   : > { %v1079_v35 = vmax.f32 %v1077_v27, %v1440_v34  ;;  %v1121_v36 = vsel %vm1119_vm8, %v1440_v34, 0.0  ;;  %v909_v37 = vpop.f32.mrb[5].mxu1 }
 0x209   : > { %v1123_v38 = vadd.f32 %v1121_v36, %v1109_v30  ;;  %v1078_v39 = vmax.f32 %v1076_v31, %v909_v37  ;;  %v1120_v40 = vsel %vm1118_vm9, %v909_v37, 0.0 }
 0x20a   : > { %v1122_v41 = vadd.f32 %v1120_v40, %v1108_v33 }
 0x20b   : > { %v1450_v42 = vpop.f32.mrb[6].mxu1 }
 0x20c   : > { %v1081_v43 = vmax.f32 %v1079_v35, %v1450_v42  ;;  %v1135_v44 = vsel %vm1133_vm10, %v1450_v42, 0.0  ;;  %v1067_v45 = vpop.f32.mrb[7].mxu1 }
 0x20d   : > { %v1884_v46 = vadd.f32 %v1135_v44, %v1123_v38  ;;  %v1080_v47 = vmax.f32 %v1078_v39, %v1067_v45  ;;  %v1134_v48 = vsel %vm1132_vm11, %v1067_v45, 0.0 }
 0x20e   : > { %v1083_v49 = vsub.f32 %v1420_v22, %v1081_v43  ;;  %v1097_v50 = vsub.f32 %v1430_v26, %v1081_v43  ;;  %v1111_v51 = vsub.f32 %v1440_v34, %v1081_v43  ;;  %v1125_v52 = vsub.f32 %v1450_v42, %v1081_v43 }
 0x20f   : > { %v1082_v53 = vsub.f32 %v593_v24, %v1080_v47  ;;  %v1096_v54 = vsub.f32 %v751_v29, %v1080_v47  ;;  %v1110_v55 = vsub.f32 %v909_v37, %v1080_v47  ;;  %v1124_v56 = vsub.f32 %v1067_v45, %v1080_v47 }
 0x210   : > { %v1086_v57 = vmul.f32 1.442695, %v1083_v49  ;;  %v1100_v58 = vmul.f32 1.442695, %v1097_v50  ;;  %v1114_v59 = vmul.f32 1.442695, %v1111_v51  ;;  %v1136_v60 = vadd.f32 %v1134_v48, %v1122_v41 }
 0x211   : > { %v1128_v61 = vmul.f32 1.442695, %v1125_v52  ;;  %v1084_v62 = vmul.f32 1.442695, %v1082_v53  ;;  %v1098_v63 = vmul.f32 1.442695, %v1096_v54  ;;  %v1178_v26 = vadd.f32 %v1177_v23, %v1176_v21 }
 0x212   : > { %1520 = vpow2.f32 %v1086_v57  ;;  %v1112_v0 = vmul.f32 1.442695, %v1110_v55  ;;  %v1126_v1 = vmul.f32 1.442695, %v1124_v56 }
 0x213   : > { %1522 = vpow2.f32 %v1100_v58  ;;  %v1179_v29 = vrot.slane %v1178_v26, 2 }
 0x214   : > { %1524 = vpow2.f32 %v1114_v59 }
 0x215   : > { %1526 = vpow2.f32 %v1128_v61  ;;  %v1180_v31 = vadd.f32 %v1179_v29, %v1178_v26 }
 0x216   : > { %1528 = vpow2.f32 %v1084_v62 }
 0x217   : > { %1530 = vpow2.f32 %v1098_v63  ;;  %v1181_v33 = vrot.slane %v1180_v31, 1 }
 0x218   : > { %1532 = vpow2.f32 %v1112_v0 }
 0x219   : > { %1534 = vpow2.f32 %v1126_v1  ;;  %v1182_v36 = vadd.f32 %v1181_v33, %v1180_v31 }
 0x21b   : > { %1183 = vst.msk [vmem:[%s432_s9] sm:$0x1] %vm1174_vm12, %v1182_v36 }
 0x21c   : > { %v1521_v2 = vpop.eup %1520 }
 0x21d   : > { %v1523_v3 = vpop.eup %1522 }
 0x21e   : > { %v1525_v4 = vpop.eup %1524  ;;  %v1103_v5 = vadd.f32 %v1523_v3, %v1521_v2 }
 0x21f   : > { %v1527_v6 = vpop.eup %1526 }
 0x220   : > { %v1529_v7 = vpop.eup %1528  ;;  %v1117_v8 = vadd.f32 %v1525_v4, %v1103_v5 }
 0x221   : > { %v1531_v9 = vpop.eup %1530 }
 0x222   : > { %v1102_v10 = vadd.f32 %v1531_v9, %v1529_v7  ;;  %v1131_v11 = vadd.f32 %v1527_v6, %v1117_v8  ;;  %v1533_v12 = vpop.eup %1532 }
 0x223   : > { %v1535_v14 = vpop.eup %1534 }
 0x224   : > { %v1116_v13 = vadd.f32 %v1533_v12, %v1102_v10  ;;  %1536 = vlog2.f32 %v1131_v11 }
 0x226   : > { %v1130_v17 = vadd.f32 %v1535_v14, %v1116_v13 }
 0x228   : > { %1538 = vlog2.f32 %v1130_v17 }
 0x22e   : > { %v1537_v20 = vpop.eup %1536 }
 0x22f   : > { %v1141_v22 = vmul.f32 0.6931472, %v1537_v20 }
 0x231   : > { %v1143_v24 = vadd.f32 %v1141_v22, %v1081_v43 }
 0x232   : > { %v1539_v25 = vpop.eup %1538 }
 0x233   : > { %v1139_v27 = vmul.f32 0.6931472, %v1539_v25  ;;  %v1147_v28 = vsub.f32 %v1143_v24, %v1884_v46 }
 0x235   : > { %v1142_v30 = vadd.f32 %v1139_v27, %v1080_v47  ;;  %v1149_v37 = vsel %vm1145_vm3, %v1147_v28, 0.0 }
 0x236   : > { %v1154_v38 = vsel %vm1150_vm2, %v1149_v37, 0.0 }
 0x237   : > { %v1146_v32 = vsub.f32 %v1142_v30, %v1136_v60 }
 0x239   : > { %v1148_v34 = vsel %vm1144_vm1, %v1146_v32, 0.0 }
 0x23a   : > { %v1151_v35 = vsel %vm1150_vm2, %v1148_v34, 0.0 }
 0x23b   : > { %1152 = vadd.xlane.f32.xlu0 %v1151_v35 }
 0x23f   : > { %1155 = vadd.xlane.f32.xlu0 %v1154_v38 }
 0x2c8   : > { %v1153_v39 = vpop.xlane.xlu0 %1152 }
 0x2cc   : > { %v1156_v16 = vpop.xlane.xlu0 %1155 }
 0x2cd   : > { %v1167_v40 = vadd.f32 %v1156_v16, %v1153_v39 }
 0x2cf   : > { %v1168_v41 = vrot.slane %v1167_v40, 4 }
 0x2d1   : > { %v1169_v42 = vadd.f32 %v1168_v41, %v1167_v40 }
 0x2d3   : > { %v1170_v43 = vrot.slane %v1169_v42, 2 }
 0x2d5   : > { %v1171_v44 = vadd.f32 %v1170_v43, %v1169_v42 }
 0x2d7   : > { %v1172_v45 = vrot.slane %v1171_v44, 1 }
 0x2d9   : > { %v1173_v46 = vadd.f32 %v1172_v45, %v1171_v44 }
 0x2db   : > { %1175 = vst.msk [vmem:[%s426_s25] sm:$0x1] %vm1174_vm12, %v1173_v46 }
 0x2dc PF: > { %s20_s23 = sadd.s32 1, %s1652_s23   ;;  %s1942_s28 = smov %s1823_s18 }
 0x2dd   : > { %p17_p10 = scmp.ge.s32.totalorder %s20_s23, 6   ;;  %s1943_s18 = smov %s1636_s19 }
 0x2de   : > { %s1944_s19 = smov %s1640_s20  ;;  %s1945_s20 = smov %s1942_s28 }
 0x2df   : > { %s1946_s21 = smov %s1648_s22  ;;  %s1947_s22 = smov %s1949_s24 }
 0x2e0   :  { %19 = sbr.rel (!%p17_p10) target bundleno = 5 (0x5), region = 101 }
 0x2e7   :  { %1225 = vsyncpa [#allocation3], 1 }
 0x2e8   :  { %1227 = vsyncpa [#allocation3 + $0x1], 1 }
 0x2e9   :  { %1228 = vsyncpa [#allocation5], 1 }

</bundles_post_ra>
